<compile_context>
chip_gen: v7x
topology: tpu7x:2x2x1
jax: 0.10.0
libtpu: 0.0.40
codegen_flags: <defaults>
</compile_context>

<pallas_src>
import functools

import jax
import jax.numpy as jnp
from jax.experimental import pallas as pl
from jax.experimental.pallas import tpu as pltpu

_LANE = 128          # lane width: pad output / intermediate channels to this
_SUBLANE_BF16 = 16   # bf16 sublane packing; pad batch only to this multiple


def _round_up(x, m):
    return (x + m - 1) // m * m


def _cdiv(a, b):
    return (a + b - 1) // b


# ---------------------------------------------------------------------------
# Pallas kernel: adapter matmul (bf16 -> f32 acc) -> bias -> exact GELU (f32)
# -> block-diagonal classifier matmul (bf16 -> f32 acc) -> bias -> lane-dense
# store.
# ---------------------------------------------------------------------------
def _gelu_exact(x):
    # nn.GELU() default in PyTorch is the exact erf formulation.
    inv_sqrt2 = jnp.float32(0.7071067811865476)
    return 0.5 * x * (1.0 + jax.lax.erf(x * inv_sqrt2))


def _head_kernel(x_ref, wa_ref, ba_ref, wc_ref, bc_ref, out_ref):
    # x: (TB, H) bf16, wa: (H, C_pad) bf16 -> MXU bf16 path, f32 accumulate.
    h = jnp.dot(x_ref[...], wa_ref[...], preferred_element_type=jnp.float32)
    h = _gelu_exact(h + ba_ref[...])                       # f32 bias + GELU
    # Second matmul also in bf16 (f32 has no native MXU path), f32 accumulate.
    logits = jnp.dot(h.astype(jnp.bfloat16), wc_ref[...],
                     preferred_element_type=jnp.float32)
    out_ref[...] = (logits + bc_ref[...]).astype(out_ref.dtype)


def softmax_head(pooled, w_adapter_p, b_adapter_p, w_cls_p, b_cls_p, *, tb):
    """pooled: (B_pad, H) bf16; w_adapter_p: (H, C_pad) bf16; b_adapter_p:
    (1, C_pad) f32; w_cls_p: (C_pad, L_pad) bf16 (block-diag, zero-padded);
    b_cls_p: (1, L_pad) f32 -> logits (B_pad, L_pad) f32.  Ragged last batch
    tile is allowed (OOB output rows are masked on store)."""
    B_pad, H = pooled.shape
    C_pad = w_adapter_p.shape[1]
    L_pad = w_cls_p.shape[1]
    grid = (_cdiv(B_pad, tb),)

    # VMEM guard: only raise the scoped limit when the estimated footprint
    # (double-buffered x/out tiles + resident weights + f32 intermediates)
    # would exceed v5e's 16 MiB default scoped VMEM.  Cap at 64 MiB (v7x
    # physical VMEM is the smallest of the three chips).
    weight_bytes = (H * C_pad * 2 + C_pad * 4 + C_pad * L_pad * 2 + L_pad * 4)
    est_bytes = (2 * tb * H * 2          # x tile, double-buffered bf16
                 + 2 * tb * L_pad * 4    # out tile, double-buffered f32
                 + 2 * weight_bytes      # constant-index weights (2 bufs)
                 + 2 * tb * C_pad * 4)   # f32 intermediate h (+ bf16 copy)
    compiler_kwargs = dict(dimension_semantics=("parallel",))  # v7x: both TCs
    if est_bytes * 2 > (16 << 20):
        compiler_kwargs["vmem_limit_bytes"] = int(min(est_bytes * 2, 64 << 20))

    return pl.pallas_call(
        _head_kernel,
        out_shape=jax.ShapeDtypeStruct((B_pad, L_pad), jnp.float32),
        grid=grid,
        in_specs=[
            pl.BlockSpec((tb, H), lambda i: (i, 0)),        # batch-tiled input
            pl.BlockSpec((H, C_pad), lambda i: (0, 0)),     # weights resident
            pl.BlockSpec((1, C_pad), lambda i: (0, 0)),
            pl.BlockSpec((C_pad, L_pad), lambda i: (0, 0)),
            pl.BlockSpec((1, L_pad), lambda i: (0, 0)),
        ],
        out_specs=pl.BlockSpec((tb, L_pad), lambda i: (i, 0)),
        compiler_params=pltpu.CompilerParams(**compiler_kwargs),
    )(pooled, w_adapter_p, b_adapter_p, w_cls_p, b_cls_p)


# ---------------------------------------------------------------------------
# Parameter construction (deterministic) and one-time packing.
# ---------------------------------------------------------------------------
def init_params(key, vocab_size, hidden_size, num_labels, class_dim):
    C = num_labels * class_dim
    k0, k1, k2, k3, k4 = jax.random.split(key, 5)
    emb = jax.random.normal(k0, (vocab_size, hidden_size), jnp.float32) * 0.02
    # adapter: Conv1d(1, C, kernel_size=hidden) weight (C, 1, hidden) -> (C, H)
    w_adapter = jax.random.normal(k1, (C, hidden_size), jnp.float32) / jnp.sqrt(
        jnp.float32(hidden_size))
    b_adapter = jax.random.normal(k2, (C,), jnp.float32) * 0.01
    # classifier: Conv1d(C, L, 1, groups=L) weight (L, class_dim, 1) -> (L, D)
    w_cls = jax.random.normal(k3, (num_labels, class_dim), jnp.float32) / jnp.sqrt(
        jnp.float32(class_dim))
    b_cls = jax.random.normal(k4, (num_labels,), jnp.float32) * 0.01
    return dict(emb=emb, w_adapter=w_adapter, b_adapter=b_adapter,
                w_cls=w_cls, b_cls=b_cls)


def pack_params(params):
    """One-time packing: transpose, lane-pad, block-diagonalize, bf16 casts.
    Runs once per model, NOT per forward call."""
    num_labels, class_dim = params["w_cls"].shape
    C, H = params["w_adapter"].shape
    C_pad = _round_up(C, _LANE)
    L_pad = _round_up(num_labels, _LANE)

    wa = jnp.zeros((H, C_pad), jnp.float32).at[:, :C].set(params["w_adapter"].T)
    ba = jnp.zeros((1, C_pad), jnp.float32).at[0, :C].set(params["b_adapter"])
    row = jnp.arange(C)
    col = row // class_dim
    wc = jnp.zeros((C_pad, L_pad), jnp.float32).at[row, col].set(
        params["w_cls"].reshape(-1))
    bc = jnp.zeros((1, L_pad), jnp.float32).at[0, :num_labels].set(
        params["b_cls"])

    return dict(emb=params["emb"].astype(jnp.bfloat16),   # bf16 gather source
                w_adapter=wa.astype(jnp.bfloat16),         # bf16 MXU operands
                b_adapter=ba,
                w_cls=wc.astype(jnp.bfloat16),             # bf16 MXU operands
                b_cls=bc)


# ---------------------------------------------------------------------------
# Forward glue.
# ---------------------------------------------------------------------------
@functools.partial(jax.jit, static_argnames=("num_labels", "tb"))
def forward(packed, input_ids, attention_mask=None, *, num_labels, tb=512):
    # TODO(synk): attention_mask accepted but unused by the BERT stub.
    del attention_mask
    # --- BERT stub: gather ONLY the CLS token's embedding, already bf16 ------
    pooled = packed["emb"][input_ids[:, 0]]            # (B, H) bf16
    # dropout -> identity (eval mode)
    B, H = pooled.shape

    # Pad only to the bf16 sublane multiple (no full-batch zero-pad copy, no
    # rounding up to a tile multiple -- the grid handles the ragged last tile).
    B_pad = _round_up(max(B, 1), _SUBLANE_BF16)
    if B_pad != B:
        pooled = jnp.pad(pooled, ((0, B_pad - B), (0, 0)))

    # v7x has 2 TensorCores: clamp tb so the grid has >= 2 steps when the
    # batch allows it; keep tb a multiple of the bf16 sublane packing.
    tb = max(_SUBLANE_BF16,
             min(tb, _round_up(_cdiv(B_pad, 2), _SUBLANE_BF16)))

    logits_pad = softmax_head(pooled, packed["w_adapter"],
                              packed["b_adapter"], packed["w_cls"],
                              packed["b_cls"], tb=tb)
    logits = logits_pad[:B, :num_labels]               # slice off lane padding
    return (logits,)


def forward_reference(params, input_ids):
    """Plain-JAX f32 reference mirroring the PyTorch math, for a sanity check."""
    emb = params["emb"]
    num_labels, class_dim = params["w_cls"].shape
    pooled = emb[input_ids[:, 0]]                                # (B, H)
    h = pooled @ params["w_adapter"].T + params["b_adapter"]     # (B, C)
    h = 0.5 * h * (1.0 + jax.lax.erf(h / jnp.sqrt(jnp.float32(2.0))))
    h = h.reshape(h.shape[0], num_labels, class_dim)
    logits = jnp.einsum("bld,ld->bl", h, params["w_cls"]) + params["b_cls"]
    return logits


if __name__ == "__main__":
    # Small shapes consistent with the module's forward.
    vocab_size = 50
    hidden_size = 32          # bert.config.hidden_size
    num_labels = 4            # len(all_agents), agents_extended = 0
    class_dim = 8             # model_config['classification_dim']

    key = jax.random.PRNGKey(0)
    kp, ki1, ki2 = jax.random.split(key, 3)
    params = init_params(kp, vocab_size, hidden_size, num_labels, class_dim)
    packed = pack_params(params)      # one-time weight packing (hoisted)

    ok = True
    # Case 1: tiny batch (single grid step).  Case 2: batch not a multiple of
    # the tile -> exercises the multi-step grid and the ragged last tile.
    for batch, seq, kk in ((2, 8, ki1), (37, 8, ki2)):
        input_ids = jax.random.randint(kk, (batch, seq), 0, vocab_size, jnp.int32)
        attention_mask = jnp.ones((batch, seq), jnp.int32)

        (logits,) = forward(packed, input_ids, attention_mask,
                            num_labels=num_labels)
        logits = jax.block_until_ready(logits)

        ref = forward_reference(params, input_ids)
        assert logits.shape == (batch, num_labels)
        # bf16 matmul operands (both matmuls) with f32 accumulate -> looser
        # tolerance than a pure-f32 reference.
        ok &= bool(jnp.allclose(logits, ref, atol=3e-3, rtol=3e-2))
        assert ok, (batch, float(jnp.max(jnp.abs(logits - ref))))

    print("KERNEL_OK")
</pallas_src>

<mosaic_0001>
module attributes {stable_mosaic.version = 11 : i64} {
  func.func @_head_kernel(%arg0: i32, %arg1: memref<16x32xbf16, #tpu.memory_space<vmem>>, %arg2: memref<32x128xbf16, #tpu.memory_space<vmem>>, %arg3: memref<1x128xf32, #tpu.memory_space<vmem>>, %arg4: memref<128x128xbf16, #tpu.memory_space<vmem>>, %arg5: memref<1x128xf32, #tpu.memory_space<vmem>>, %arg6: memref<16x128xf32, #tpu.memory_space<vmem>>) attributes {dimension_semantics = [#tpu.dimension_semantics<parallel>], iteration_bounds = array<i64: 1>, scalar_prefetch = 0 : i64, scratch_operands = 0 : i64, tpu.core_type = #tpu.core_type<tc>, window_params = [{transform_indices = @transform_0, window_bounds = array<i64: 16, 32>}, {pipeline_mode = #tpu.pipeline_mode<synchronous>, transform_indices = @transform_1, window_bounds = array<i64: 32, 128>}, {pipeline_mode = #tpu.pipeline_mode<synchronous>, transform_indices = @transform_2, window_bounds = array<i64: 1, 128>}, {pipeline_mode = #tpu.pipeline_mode<synchronous>, transform_indices = @transform_3, window_bounds = array<i64: 128, 128>}, {pipeline_mode = #tpu.pipeline_mode<synchronous>, transform_indices = @transform_4, window_bounds = array<i64: 1, 128>}, {transform_indices = @transform_5, window_bounds = array<i64: 16, 128>}]} {
    %c0 = arith.constant 0 : index
    %c0_0 = arith.constant 0 : index
    %0 = vector.load %arg1[%c0, %c0_0] : memref<16x32xbf16, #tpu.memory_space<vmem>>, vector<16x32xbf16>
    %c0_1 = arith.constant 0 : index
    %c0_2 = arith.constant 0 : index
    %1 = vector.load %arg2[%c0_1, %c0_2] : memref<32x128xbf16, #tpu.memory_space<vmem>>, vector<32x128xbf16>
    %cst = arith.constant dense<0.000000e+00> : vector<16x128xf32>
    %2 = tpu.matmul %0, %1, %cst {dimension_numbers = #tpu.dot_dimension_numbers<[1], [0], [0], [1], [0, 0, 1, 1], [], []>} : vector<16x32xbf16>, vector<32x128xbf16>, vector<16x128xf32> -> vector<16x128xf32>
    %c0_3 = arith.constant 0 : index
    %c0_4 = arith.constant 0 : index
    %3 = vector.load %arg3[%c0_3, %c0_4] : memref<1x128xf32, #tpu.memory_space<vmem>>, vector<1x128xf32>
    %4 = vector.broadcast %3 : vector<1x128xf32> to vector<16x128xf32>
    %5 = arith.addf %2, %4 : vector<16x128xf32>
    %cst_5 = arith.constant 5.000000e-01 : f32
    %6 = vector.broadcast %cst_5 : f32 to vector<16x128xf32>
    %7 = arith.mulf %6, %5 : vector<16x128xf32>
    %cst_6 = arith.constant 0.707106769 : f32
    %8 = vector.broadcast %cst_6 : f32 to vector<16x128xf32>
    %9 = arith.mulf %5, %8 : vector<16x128xf32>
    %10 = math.erf %9 : vector<16x128xf32>
    %cst_7 = arith.constant 1.000000e+00 : f32
    %11 = vector.broadcast %cst_7 : f32 to vector<16x128xf32>
    %12 = arith.addf %11, %10 : vector<16x128xf32>
    %13 = arith.mulf %7, %12 : vector<16x128xf32>
    %14 = arith.truncf %13 : vector<16x128xf32> to vector<16x128xbf16>
    %c0_8 = arith.constant 0 : index
    %c0_9 = arith.constant 0 : index
    %15 = vector.load %arg4[%c0_8, %c0_9] : memref<128x128xbf16, #tpu.memory_space<vmem>>, vector<128x128xbf16>
    %cst_10 = arith.constant dense<0.000000e+00> : vector<16x128xf32>
    %16 = tpu.matmul %14, %15, %cst_10 {dimension_numbers = #tpu.dot_dimension_numbers<[1], [0], [0], [1], [0, 0, 1, 1], [], []>} : vector<16x128xbf16>, vector<128x128xbf16>, vector<16x128xf32> -> vector<16x128xf32>
    %c0_11 = arith.constant 0 : index
    %c0_12 = arith.constant 0 : index
    %17 = vector.load %arg5[%c0_11, %c0_12] : memref<1x128xf32, #tpu.memory_space<vmem>>, vector<1x128xf32>
    %18 = vector.broadcast %17 : vector<1x128xf32> to vector<16x128xf32>
    %19 = arith.addf %16, %18 : vector<16x128xf32>
    %c0_13 = arith.constant 0 : index
    %c0_14 = arith.constant 0 : index
    %20 = vector.load %arg6[%c0_13, %c0_14] : memref<16x128xf32, #tpu.memory_space<vmem>>, vector<16x128xf32>
    tpu.vector_store %arg6[%c0_13, %c0_14], %19 {strides = array<i32>} : memref<16x128xf32, #tpu.memory_space<vmem>>, vector<16x128xf32>,
    return
  }
  func.func @transform_0(%arg0: i32) -> (i32, i32) {
    %c0_i32 = arith.constant 0 : i32
    %c0_i32_0 = arith.constant 0 : i32
    return %arg0, %c0_i32 : i32, i32
  }
  func.func @transform_1(%arg0: i32) -> (i32, i32) {
    %c0_i32 = arith.constant 0 : i32
    %c0_i32_0 = arith.constant 0 : i32
    %c0_i32_1 = arith.constant 0 : i32
    return %c0_i32, %c0_i32_0 : i32, i32
  }
  func.func @transform_2(%arg0: i32) -> (i32, i32) {
    %c0_i32 = arith.constant 0 : i32
    %c0_i32_0 = arith.constant 0 : i32
    %c0_i32_1 = arith.constant 0 : i32
    return %c0_i32, %c0_i32_0 : i32, i32
  }
  func.func @transform_3(%arg0: i32) -> (i32, i32) {
    %c0_i32 = arith.constant 0 : i32
    %c0_i32_0 = arith.constant 0 : i32
    %c0_i32_1 = arith.constant 0 : i32
    return %c0_i32, %c0_i32_0 : i32, i32
  }
  func.func @transform_4(%arg0: i32) -> (i32, i32) {
    %c0_i32 = arith.constant 0 : i32
    %c0_i32_0 = arith.constant 0 : i32
    %c0_i32_1 = arith.constant 0 : i32
    return %c0_i32, %c0_i32_0 : i32, i32
  }
  func.func @transform_5(%arg0: i32) -> (i32, i32) {
    %c0_i32 = arith.constant 0 : i32
    %c0_i32_0 = arith.constant 0 : i32
    return %arg0, %c0_i32 : i32, i32
  }
}

</mosaic_0001>

<bundles_post_ra>
// kernel: forward.1
= control target key start
LH: loop header
LB: loop body
LE: loop exit
PB: predicated region body
PF: predicated region fallthrough
CT: control target
= control target key end

     0   :  { %v296_v0 = vmov 0.0   ;;  %vm297_vm0 = vmmov 0   ;;  %vm51_vm1 = vcmask 261120   ;;  %s373_s1 = inlined_call_operand.vmem [shape: bf16[32,128], index: 1, kind: input, shape index: {}]   ;;  %s374_s3 = inlined_call_operand.vmem [shape: bf16[128,128], index: 3, kind: input, shape index: {}]   ;;  %s375_s0 = inlined_call_operand.vmem [shape: bf16[16,32], index: 0, kind: input, shape index: {}]   ;;  %s376_s2 = inlined_call_operand.vmem [shape: f32[1,128], index: 2, kind: input, shape index: {}]   ;;  %s377_s4 = inlined_call_operand.vmem [shape: f32[1,128], index: 4, kind: input, shape index: {}]   ;;  %s378_s5 = inlined_call_operand.vmem [shape: f32[16,128], index: 5, kind: output, shape index: {}]  }
   0x1   :  { %251 = vmatprep.subr.bf16.mxu0 %v296_v0  ;;  %v281_v1 = vld [vmem:[%s373_s1] sm:$0xff]   ;;  %255 = vmatprep.mubr.msk.bf16.mxu0 %vm297_vm0, %v296_v0  ;;  %v282_v2 = vld [vmem:[%s373_s1 + $0x8] sm:$0xff]   ;;  %v286_v6 = vld [vmem:[%s374_s3 + $0x10] sm:$0xff]  }
   0x2   :  { %259 = vmatprep.subr.bf16.mxu1 %v296_v0  ;;  %275 = vmatprep.mubr.msk.bf16.mxu1 %vm297_vm0, %v296_v0  ;;  %v284_v3 = vld [vmem:[%s374_s3] sm:$0xff]   ;;  %v285_v5 = vld [vmem:[%s374_s3 + $0x8] sm:$0xff]   ;;  %v287_v7 = vld [vmem:[%s374_s3 + $0x18] sm:$0xff]  }
   0x3   :  { %252 = vmatpush3.bf16.msra.mxu0 %v281_v1  ;;  %v283_v4 = vld [vmem:[%s375_s0] sm:$0xff]   ;;  %260 = vmatpush3.bf16.msra.mxu1 %v284_v3  ;;  %v289_v9 = vld [vmem:[%s374_s3 + $0x28] sm:$0xff]   ;;  %v290_v10 = vld [vmem:[%s374_s3 + $0x30] sm:$0xff]  }
   0x4   :  { %253 = vmatprep.subr.bf16.mxu0 %v296_v0  ;;  %261 = vmatprep.subr.bf16.mxu1 %v296_v0  ;;  %v288_v8 = vld [vmem:[%s374_s3 + $0x20] sm:$0xff]   ;;  %v291_v11 = vld [vmem:[%s374_s3 + $0x38] sm:$0xff]  }
   0x5   :  { %v225_v12 = vld [vmem:[%s376_s2] ss:$0 sm:$0xff] }
   0x6   :  { %v230_v30 = vld [vmem:[%s377_s4] ss:$0 sm:$0xff] }
   0x7   :  { %254 = vmatpush3.bf16.msra.mxu0 %v282_v2  ;;  %262 = vmatpush3.bf16.msra.mxu1 %v285_v5 }
   0x8   :  { %263 = vmatprep.subr.bf16.mxu1 %v296_v0 }
   0xa   :  { %256 = vmatmul.mubr.msk.bf16.vlgmr.msra.gmra.mrb[0].mxu0 %vm51_vm1, %v283_v4 }
   0xb   :  { %264 = vmatpush3.bf16.msra.mxu1 %v286_v6 }
   0xc   :  { %265 = vmatprep.subr.bf16.mxu1 %v296_v0 }
   0xf   :  { %266 = vmatpush3.bf16.msra.mxu1 %v287_v7 }
  0x10   :  { %267 = vmatprep.subr.bf16.mxu1 %v296_v0 }
  0x13   :  { %268 = vmatpush3.bf16.msra.mxu1 %v288_v8 }
  0x14   :  { %269 = vmatprep.subr.bf16.mxu1 %v296_v0 }
  0x17   :  { %270 = vmatpush3.bf16.msra.mxu1 %v289_v9 }
  0x18   :  { %271 = vmatprep.subr.bf16.mxu1 %v296_v0 }
  0x1b   :  { %272 = vmatpush3.bf16.msra.mxu1 %v290_v10 }
  0x1c   :  { %273 = vmatprep.subr.bf16.mxu1 %v296_v0 }
  0x1f   :  { %274 = vmatpush3.bf16.msra.mxu1 %v291_v11 }
  0xdd   :  { %v89_v13 = vpop.f32.mrb[0].mxu0 }
  0xde   :  { %v90_v14 = vadd.f32 %v225_v12, %v89_v13  ;;  %v257_v15 = vpop.f32.mrb[1].mxu0 }
  0xdf   :  { %v92_v16 = vpop.f32.mrb[2].mxu0 }
  0xe0   :  { %v98_v17 = vmul.f32 0.70710677, %v90_v14  ;;  %v93_v18 = vadd.f32 %v225_v12, %v92_v16  ;;  %v258_v19 = vpop.f32.mrb[3].mxu0  ;;  %v96_v24 = vmul.f32 0.5, %v90_v14 }
  0xe2   :  { %292 = verf.f32 %v98_v17  ;;  %v99_v20 = vmul.f32 0.70710677, %v93_v18  ;;  %v97_v25 = vmul.f32 0.5, %v93_v18 }
  0xe4   :  { %294 = verf.f32 %v99_v20 }
  0xec   :  { %v293_v21 = vpop.eup %292 }
  0xed   :  { %v102_v22 = vadd.f32 1.0, %v293_v21 }
  0xee   :  { %v295_v23 = vpop.eup %294 }
  0xef   :  { %v103_v26 = vadd.f32 1.0, %v295_v23  ;;  %v104_v27 = vmul.f32 %v102_v22, %v96_v24 }
  0xf1   :  { %v105_v28 = vmul.f32 %v103_v26, %v97_v25 }
  0xf3   :  { %v106_v29 = vpack.c.bf16 %v105_v28, %v104_v27 }
  0xf5   :  { %276 = vmatmul.mubr.bf16.vlgmr.msra.gmra.mrb[0].mxu1 %v106_v29 }
 0x1c8   :  { %v212_v31 = vpop.f32.mrb[0].mxu1 }
 0x1c9   :  { %v213_v32 = vadd.f32 %v230_v30, %v212_v31  ;;  %v277_v33 = vpop.f32.mrb[1].mxu1 }
 0x1ca   :  { %v215_v34 = vpop.f32.mrb[2].mxu1 }
 0x1cb   :  { %219 = vst [vmem:[%s378_s5] sm:$0xff] %v213_v32  ;;  %v216_v35 = vadd.f32 %v230_v30, %v215_v34  ;;  %v278_v36 = vpop.f32.mrb[3].mxu1 }
 0x1cd   :  { %220 = vst [vmem:[%s378_s5 + $0x8] sm:$0xff] %v216_v35 }

</bundles_post_ra>
